<compile_context>
chip_gen: v7x
topology: tpu7x:2x2x1
jax: 0.10.0
libtpu: 0.0.40
codegen_flags: <defaults>
</compile_context>

<pallas_src>
import math

import jax
import jax.numpy as jnp
from jax import lax
from jax.experimental import pallas as pl
from jax.experimental.pallas import tpu as pltpu

OUT_PAD = 128   # lane-dense output slab width (columns 0/1 carry the two heads)
K_PAD = 8       # padded contraction depth for the MXU fourier projection


def _round_up(x, m):
    return (x + m - 1) // m * m


def rf_critic_kernel(x_ref, w_ref, b_ref, head_ref, ob_ref, out_ref):
    """One batch tile of the fused RFVCritic forward.

    x_ref    : (TB, K_PAD)    states padded to K=8 (cols >= s_dim are zero)
    w_ref    : (K_PAD, 2F)    fused (embed-folded) fourier weights, K-padded
    b_ref    : (1, 2F)        fused (embed-folded) fourier bias
    head_ref : (2F, OUT_PAD)  block-diag head weights with 10*gamma folded in
                              AND LayerNorm mean-centering pre-folded
                              (h' = h - mean(h) per head)
    ob_ref   : (1, OUT_PAD)   constant output bias (10 * beta . o_w), zero by default
    out_ref  : (TB, OUT_PAD)  column 0 = head1, column 1 = head2
    """
    eps = 1e-5

    # Fourier projection on the MXU (K padded to 8 -> near-zero MXU cost,
    # frees the saturated VALU slot).
    z = (jnp.dot(x_ref[...], w_ref[...], preferred_element_type=jnp.float32)
         + b_ref[...])                                   # (TB, 2F)
    c = jnp.cos(z)                                       # EUP; (TB, 2F)

    two_f = c.shape[1]
    F = two_f // 2
    inv_f = 1.0 / F

    # Head dot: centering is already folded into head_ref, so column i equals
    # sum_j (c_j - mu) * (10*gamma_j*o_w_j) for its head.
    raw = jnp.dot(c, head_ref[...], preferred_element_type=jnp.float32)  # (TB, OUT_PAD)

    def inv_std(ch):
        # biased-variance LayerNorm scale from first/second moments
        mu = jnp.sum(ch, axis=-1, keepdims=True) * inv_f
        m2 = jnp.sum(ch * ch, axis=-1, keepdims=True) * inv_f
        return lax.rsqrt(m2 - mu * mu + eps)             # (TB, 1)

    std1 = inv_std(c[:, :F])                             # lane-aligned slices (F % 128 == 0)
    std2 = inv_std(c[:, F:])

    # Per-row scale applied only on the narrow (TB, 128) output: column 0 uses
    # head-1 stats, everything else head-2 (columns >= 2 are garbage anyway).
    col0 = lax.broadcasted_iota(jnp.int32, raw.shape, 1) == 0
    scale = jnp.where(col0, std1, std2)
    out_ref[...] = raw * scale + ob_ref[...]


def make_params(key, s_dim=3, rf_num=256, sigma=0.0):
    """Parameters matching the PyTorch module's initialization."""
    k1, k2, k3, k4, k5, k6 = jax.random.split(key, 6)
    std = (1.0 / sigma) if sigma > 0 else 1.0
    bound = 1.0 / math.sqrt(rf_num)
    return {
        # embed: identity weight, zero bias (embedding_dim == -1 branch, frozen)
        "embed_w": jnp.eye(s_dim, dtype=jnp.float32),            # (out, in)
        "embed_b": jnp.zeros((s_dim,), jnp.float32),
        "f1_w": std * jax.random.normal(k1, (rf_num, s_dim), jnp.float32),
        "f1_b": jax.random.uniform(k2, (rf_num,), jnp.float32, 0.0, 2.0 * math.pi),
        "f2_w": std * jax.random.normal(k3, (rf_num, s_dim), jnp.float32),
        "f2_b": jax.random.uniform(k4, (rf_num,), jnp.float32, 0.0, 2.0 * math.pi),
        # LayerNorm affine (default init: gamma=1, beta=0; beta frozen)
        "g1": jnp.ones((rf_num,), jnp.float32),
        "beta1": jnp.zeros((rf_num,), jnp.float32),
        "g2": jnp.ones((rf_num,), jnp.float32),
        "beta2": jnp.zeros((rf_num,), jnp.float32),
        # output heads: default Linear weight init, zero (frozen) bias
        "o1_w": jax.random.uniform(k5, (1, rf_num), jnp.float32, -bound, bound),
        "o2_w": jax.random.uniform(k6, (1, rf_num), jnp.float32, -bound, bound),
    }


def prepare_kernel_params(params):
    """One-time host-side folding. Do NOT call per forward step.

    NOTE: if LN affine or head weights are ever trained, this fold must be
    re-run after every update.
    """
    ew, eb = params["embed_w"], params["embed_b"]            # (S, S), (S,)

    def fold(fw, fb):                                        # fold embed into fourier
        return fw @ ew, fw @ eb + fb                         # (F, S), (F,)

    w1, b1 = fold(params["f1_w"], params["f1_b"])
    w2, b2 = fold(params["f2_w"], params["f2_b"])
    F, S = w1.shape

    # Fused fourier weight padded to K_PAD rows (rows >= S are zero).
    w_fused = jnp.zeros((K_PAD, 2 * F), jnp.float32)
    w_fused = w_fused.at[:S, :F].set(w1.T).at[:S, F:].set(w2.T)
    b_fused = jnp.concatenate([b1, b2]).reshape(1, 2 * F)

    # Block-diagonal head with 10*gamma folded in AND LayerNorm mean-centering
    # folded in: sum_j c_j (h_j - mean(h)) == sum_j (c_j - mu) h_j.
    h1 = 10.0 * params["g1"] * params["o1_w"][0]
    h2 = 10.0 * params["g2"] * params["o2_w"][0]
    head = jnp.zeros((2 * F, OUT_PAD), jnp.float32)
    head = head.at[:F, 0].set(h1 - jnp.mean(h1))
    head = head.at[F:, 1].set(h2 - jnp.mean(h2))

    # Constant output bias from LN beta (zero for the default module).
    out_bias = jnp.zeros((1, OUT_PAD), jnp.float32)
    out_bias = out_bias.at[0, 0].set(10.0 * jnp.dot(params["beta1"], params["o1_w"][0]))
    out_bias = out_bias.at[0, 1].set(10.0 * jnp.dot(params["beta2"], params["o2_w"][0]))

    return {"w": w_fused, "b": b_fused, "head": head, "out_bias": out_bias}


def rf_critic_forward(states, kparams, *, block_b=1024):
    B, S = states.shape
    KP = kparams["w"].shape[0]

    # Batch tiling: big tiles amortize the ~0.35us/step pipeline overhead;
    # clamp at 2048 so live (TB, 2F) temporaries stay inside the 32 MiB cap.
    block_b = min(block_b, 2048)
    TB = min(block_b, _round_up(B, 8))
    B_pad = _round_up(B, TB)
    # Single copy that both pads the batch to the tile and K to K_PAD.
    x = jnp.zeros((B_pad, KP), states.dtype).at[:B, :S].set(states)
    grid = (B_pad // TB,)

    resident = lambda shape: pl.BlockSpec(shape, lambda i: (0, 0))  # VMEM-resident weights

    out = pl.pallas_call(
        rf_critic_kernel,
        out_shape=jax.ShapeDtypeStruct((B_pad, OUT_PAD), jnp.float32),
        grid=grid,
        in_specs=[
            pl.BlockSpec((TB, KP), lambda i: (i, 0)),
            resident(kparams["w"].shape),
            resident(kparams["b"].shape),
            resident(kparams["head"].shape),
            resident(kparams["out_bias"].shape),
        ],
        out_specs=pl.BlockSpec((TB, OUT_PAD), lambda i: (i, 0)),
        compiler_params=pltpu.CompilerParams(
            dimension_semantics=("parallel",),
            # explicit: raises v5e's 16 MiB scoped default, matches v6e/v7x
            # defaults, and comfortably covers TB up to 2048.
            vmem_limit_bytes=32 * 1024 * 1024),
    )(x, kparams["w"], kparams["b"], kparams["head"], kparams["out_bias"])

    # One narrow read of the padded slab instead of two strided column gathers.
    pair = out[:B, :2]
    return pair[:, 0:1], pair[:, 1:2]


def rf_critic_reference(states, params):
    """Pure-JAX reference mirroring the PyTorch forward (unfused)."""
    eps = 1e-5
    x = states @ params["embed_w"].T + params["embed_b"]
    z1 = x @ params["f1_w"].T + params["f1_b"]
    z2 = x @ params["f2_w"].T + params["f2_b"]
    c1, c2 = jnp.cos(z1), jnp.cos(z2)

    def ln(c, g, b):
        mu = jnp.mean(c, -1, keepdims=True)
        var = jnp.mean((c - mu) ** 2, -1, keepdims=True)
        return (c - mu) / jnp.sqrt(var + eps) * g + b

    y1 = 10.0 * ln(c1, params["g1"], params["beta1"])
    y2 = 10.0 * ln(c2, params["g2"], params["beta2"])
    return y1 @ params["o1_w"].T, y2 @ params["o2_w"].T


if __name__ == "__main__":
    key = jax.random.PRNGKey(0)
    kp, kx = jax.random.split(key)

    S_DIM = 3
    RF_NUM = 256
    B = 8

    params = make_params(kp, s_dim=S_DIM, rf_num=RF_NUM, sigma=0.0)
    kparams = prepare_kernel_params(params)          # host-side fold, done once
    states = jax.random.normal(kx, (B, S_DIM), jnp.float32)

    fwd = jax.jit(rf_critic_forward, static_argnames=("block_b",))
    out1, out2 = fwd(states, kparams)
    jax.block_until_ready((out1, out2))

    ref1, ref2 = rf_critic_reference(states, params)
    assert out1.shape == (B, 1) and out2.shape == (B, 1)
    assert jnp.allclose(out1, ref1, atol=1e-3, rtol=1e-3), float(jnp.abs(out1 - ref1).max())
    assert jnp.allclose(out2, ref2, atol=1e-3, rtol=1e-3), float(jnp.abs(out2 - ref2).max())

    # TODO(synk): soft_update / get_norm / train are training-time utilities,
    # not part of the forward pass, and are intentionally not kernelized.
    print("KERNEL_OK")
</pallas_src>

<mosaic_0001>
module attributes {stable_mosaic.version = 11 : i64} {
  func.func @rf_critic_kernel(%arg0: i32, %arg1: memref<8x8xf32, #tpu.memory_space<vmem>>, %arg2: memref<8x512xf32, #tpu.memory_space<vmem>>, %arg3: memref<1x512xf32, #tpu.memory_space<vmem>>, %arg4: memref<512x128xf32, #tpu.memory_space<vmem>>, %arg5: memref<1x128xf32, #tpu.memory_space<vmem>>, %arg6: memref<8x128xf32, #tpu.memory_space<vmem>>) attributes {dimension_semantics = [#tpu.dimension_semantics<parallel>], iteration_bounds = array<i64: 1>, scalar_prefetch = 0 : i64, scratch_operands = 0 : i64, tpu.core_type = #tpu.core_type<tc>, window_params = [{transform_indices = @transform_0, window_bounds = array<i64: 8, 8>}, {pipeline_mode = #tpu.pipeline_mode<synchronous>, transform_indices = @transform_1, window_bounds = array<i64: 8, 512>}, {pipeline_mode = #tpu.pipeline_mode<synchronous>, transform_indices = @transform_2, window_bounds = array<i64: 1, 512>}, {pipeline_mode = #tpu.pipeline_mode<synchronous>, transform_indices = @transform_3, window_bounds = array<i64: 512, 128>}, {pipeline_mode = #tpu.pipeline_mode<synchronous>, transform_indices = @transform_4, window_bounds = array<i64: 1, 128>}, {transform_indices = @transform_5, window_bounds = array<i64: 8, 128>}]} {
    %c0 = arith.constant 0 : index
    %c0_0 = arith.constant 0 : index
    %0 = vector.load %arg1[%c0, %c0_0] : memref<8x8xf32, #tpu.memory_space<vmem>>, vector<8x8xf32>
    %c0_1 = arith.constant 0 : index
    %c0_2 = arith.constant 0 : index
    %1 = vector.load %arg2[%c0_1, %c0_2] : memref<8x512xf32, #tpu.memory_space<vmem>>, vector<8x512xf32>
    %cst = arith.constant dense<0.000000e+00> : vector<8x512xf32>
    %2 = tpu.matmul %0, %1, %cst {dimension_numbers = #tpu.dot_dimension_numbers<[1], [0], [0], [1], [0, 0, 1, 1], [], []>} : vector<8x8xf32>, vector<8x512xf32>, vector<8x512xf32> -> vector<8x512xf32>
    %c0_3 = arith.constant 0 : index
    %c0_4 = arith.constant 0 : index
    %3 = vector.load %arg3[%c0_3, %c0_4] : memref<1x512xf32, #tpu.memory_space<vmem>>, vector<1x512xf32>
    %4 = vector.broadcast %3 : vector<1x512xf32> to vector<8x512xf32>
    %5 = arith.addf %2, %4 : vector<8x512xf32>
    %6 = math.cos %5 : vector<8x512xf32>
    %c0_5 = arith.constant 0 : index
    %c0_6 = arith.constant 0 : index
    %7 = vector.load %arg4[%c0_5, %c0_6] : memref<512x128xf32, #tpu.memory_space<vmem>>, vector<512x128xf32>
    %cst_7 = arith.constant dense<0.000000e+00> : vector<8x128xf32>
    %8 = tpu.matmul %6, %7, %cst_7 {dimension_numbers = #tpu.dot_dimension_numbers<[1], [0], [0], [1], [0, 0, 1, 1], [], []>} : vector<8x512xf32>, vector<512x128xf32>, vector<8x128xf32> -> vector<8x128xf32>
    %9 = vector.extract_strided_slice %6 {offsets = [0, 0], sizes = [8, 256], strides = [1, 1]} : vector<8x512xf32> to vector<8x256xf32>
    %cst_8 = arith.constant dense<0.000000e+00> : vector<8xf32>
    %10 = vector.multi_reduction <add>, %9, %cst_8 [1] : vector<8x256xf32> to vector<8xf32>
    %11 = vector.shape_cast %10 : vector<8xf32> to vector<8x1xf32>
    %cst_9 = arith.constant 3.906250e-03 : f32
    %12 = vector.broadcast %cst_9 : f32 to vector<8x1xf32>
    %13 = arith.mulf %11, %12 : vector<8x1xf32>
    %14 = arith.mulf %9, %9 : vector<8x256xf32>
    %cst_10 = arith.constant dense<0.000000e+00> : vector<8xf32>
    %15 = vector.multi_reduction <add>, %14, %cst_10 [1] : vector<8x256xf32> to vector<8xf32>
    %16 = vector.shape_cast %15 : vector<8xf32> to vector<8x1xf32>
    %cst_11 = arith.constant 3.906250e-03 : f32
    %17 = vector.broadcast %cst_11 : f32 to vector<8x1xf32>
    %18 = arith.mulf %16, %17 : vector<8x1xf32>
    %19 = arith.mulf %13, %13 : vector<8x1xf32>
    %20 = arith.subf %18, %19 : vector<8x1xf32>
    %cst_12 = arith.constant 9.99999974E-6 : f32
    %21 = vector.broadcast %cst_12 : f32 to vector<8x1xf32>
    %22 = arith.addf %20, %21 : vector<8x1xf32>
    %23 = math.rsqrt %22 : vector<8x1xf32>
    %24 = vector.extract_strided_slice %6 {offsets = [0, 256], sizes = [8, 256], strides = [1, 1]} : vector<8x512xf32> to vector<8x256xf32>
    %cst_13 = arith.constant dense<0.000000e+00> : vector<8xf32>
    %25 = vector.multi_reduction <add>, %24, %cst_13 [1] : vector<8x256xf32> to vector<8xf32>
    %26 = vector.shape_cast %25 : vector<8xf32> to vector<8x1xf32>
    %cst_14 = arith.constant 3.906250e-03 : f32
    %27 = vector.broadcast %cst_14 : f32 to vector<8x1xf32>
    %28 = arith.mulf %26, %27 : vector<8x1xf32>
    %29 = arith.mulf %24, %24 : vector<8x256xf32>
    %cst_15 = arith.constant dense<0.000000e+00> : vector<8xf32>
    %30 = vector.multi_reduction <add>, %29, %cst_15 [1] : vector<8x256xf32> to vector<8xf32>
    %31 = vector.shape_cast %30 : vector<8xf32> to vector<8x1xf32>
    %cst_16 = arith.constant 3.906250e-03 : f32
    %32 = vector.broadcast %cst_16 : f32 to vector<8x1xf32>
    %33 = arith.mulf %31, %32 : vector<8x1xf32>
    %34 = arith.mulf %28, %28 : vector<8x1xf32>
    %35 = arith.subf %33, %34 : vector<8x1xf32>
    %cst_17 = arith.constant 9.99999974E-6 : f32
    %36 = vector.broadcast %cst_17 : f32 to vector<8x1xf32>
    %37 = arith.addf %35, %36 : vector<8x1xf32>
    %38 = math.rsqrt %37 : vector<8x1xf32>
    %39 = tpu.iota {dimensions = array<i32: 1>} : vector<8x128xi32>
    %c0_i32 = arith.constant 0 : i32
    %40 = vector.broadcast %c0_i32 : i32 to vector<8x128xi32>
    %41 = arith.cmpi eq, %39, %40 : vector<8x128xi32>
    %42 = vector.shape_cast %23 : vector<8x1xf32> to vector<8x1xf32>
    %43 = vector.broadcast %42 : vector<8x1xf32> to vector<8x128xf32>
    %44 = vector.shape_cast %38 : vector<8x1xf32> to vector<8x1xf32>
    %45 = vector.broadcast %44 : vector<8x1xf32> to vector<8x128xf32>
    %46 = arith.select %41, %43, %45 : vector<8x128xi1>, vector<8x128xf32>
    %47 = arith.mulf %8, %46 : vector<8x128xf32>
    %c0_18 = arith.constant 0 : index
    %c0_19 = arith.constant 0 : index
    %48 = vector.load %arg5[%c0_18, %c0_19] : memref<1x128xf32, #tpu.memory_space<vmem>>, vector<1x128xf32>
    %49 = vector.broadcast %48 : vector<1x128xf32> to vector<8x128xf32>
    %50 = arith.addf %47, %49 : vector<8x128xf32>
    %c0_20 = arith.constant 0 : index
    %c0_21 = arith.constant 0 : index
    %51 = vector.load %arg6[%c0_20, %c0_21] : memref<8x128xf32, #tpu.memory_space<vmem>>, vector<8x128xf32>
    tpu.vector_store %arg6[%c0_20, %c0_21], %50 {strides = array<i32>} : memref<8x128xf32, #tpu.memory_space<vmem>>, vector<8x128xf32>,
    return
  }
  func.func @transform_0(%arg0: i32) -> (i32, i32) {
    %c0_i32 = arith.constant 0 : i32
    %c0_i32_0 = arith.constant 0 : i32
    return %arg0, %c0_i32 : i32, i32
  }
  func.func @transform_1(%arg0: i32) -> (i32, i32) {
    %c0_i32 = arith.constant 0 : i32
    %c0_i32_0 = arith.constant 0 : i32
    %c0_i32_1 = arith.constant 0 : i32
    return %c0_i32, %c0_i32_0 : i32, i32
  }
  func.func @transform_2(%arg0: i32) -> (i32, i32) {
    %c0_i32 = arith.constant 0 : i32
    %c0_i32_0 = arith.constant 0 : i32
    %c0_i32_1 = arith.constant 0 : i32
    return %c0_i32, %c0_i32_0 : i32, i32
  }
  func.func @transform_3(%arg0: i32) -> (i32, i32) {
    %c0_i32 = arith.constant 0 : i32
    %c0_i32_0 = arith.constant 0 : i32
    %c0_i32_1 = arith.constant 0 : i32
    return %c0_i32, %c0_i32_0 : i32, i32
  }
  func.func @transform_4(%arg0: i32) -> (i32, i32) {
    %c0_i32 = arith.constant 0 : i32
    %c0_i32_0 = arith.constant 0 : i32
    %c0_i32_1 = arith.constant 0 : i32
    return %c0_i32, %c0_i32_0 : i32, i32
  }
  func.func @transform_5(%arg0: i32) -> (i32, i32) {
    %c0_i32 = arith.constant 0 : i32
    %c0_i32_0 = arith.constant 0 : i32
    return %arg0, %c0_i32 : i32, i32
  }
}

</mosaic_0001>

<bundles_post_ra>
// kernel: rf_critic_forward.1
= control target key start
LH: loop header
LB: loop body
LE: loop exit
PB: predicated region body
PF: predicated region fallthrough
CT: control target
= control target key end

     0   :  { %10 = vsyncpa [#allocation3], 0  ;;  %s1093_s18 = smov [#allocation2]   ;;  %s1484_s0 = inlined_call_operand.vmem [shape: f32[8,8], index: 0, kind: input, shape index: {}]   ;;  %s1485_s1 = inlined_call_operand.vmem [shape: f32[8,512], index: 1, kind: input, shape index: {}]   ;;  %s1486_s2 = inlined_call_operand.vmem [shape: f32[1,512], index: 2, kind: input, shape index: {}]   ;;  %s1487_s3 = inlined_call_operand.hbm [shape: f32[512,128], index: 3, kind: input, shape index: {}]   ;;  %s1488_s4 = inlined_call_operand.vmem [shape: f32[1,128], index: 4, kind: input, shape index: {}]   ;;  %s1489_s5 = inlined_call_operand.vmem [shape: f32[8,128], index: 5, kind: output, shape index: {}]  }
   0x1   :  { %s22_s19 = sshll.u32 %s1093_s18, 4  ;;  %s1069_s22 = scalar_lea.hbm %s1487_s3, 8192  ;;  %s23_s19 = int_to_ptr.vmem [resolvable:$true] %s22_s19 }
   0x2   :  { %p1070_p0 = scmp.ne.s32.totalorder %s1487_s3, %s1069_s22  ;;  %p1073_p1 = scmp.lt.u32.totalorder %s1069_s22, %s1487_s3 }
   0x4   :  { %p1075_p2 = pnand %p1073_p1, %p1070_p0 }
   0x6   :  { %1078 = shalt.err (!%p1075_p2)
}
   0x7   :  { %s1079_s27 = scalar_lea.vmem %s23_s19, 8192  ;;  %p1084_p4 = scmp.lt.s32.totalorder %s23_s19, %s23_s19 }
   0x8   :  { %p1080_p3 = scmp.ne.s32.totalorder %s23_s19, %s1079_s27  ;;  %p1085_p5 = scmp.lt.s32.totalorder %s1079_s27, %s1079_s27 }
   0xa   :  { %p1086_p6 = por %p1085_p5, %p1084_p4 }
   0xc   :  { %p1087_p7 = pnand %p1086_p6, %p1080_p3 }
   0xe   :  { %1090 = shalt.err (!%p1087_p7)
}
   0xf   :  { %s1094_s28 = smov 128   ;;  %s1095_s29 = smov 8  }
  0x10   :  { %28 = dma.hbm_to_vmem [thread:$0]  %s1487_s3, 8192, %s23_s19, [#allocation3], %s1094_s28, %s1094_s28, %s1095_s29  }
  0x11   :  { %1091 = dma.done.wait [#allocation3], 8192  }
  0x12   :  { %1092 = vsyncadd [#allocation3], 4294959104  ;;  %v1096_v0 = vmov 0.0   ;;  %v36_v1 = vld [vmem:[%s1485_s1 + $0x8] sm:$0xff]  ;;  %v38_v2 = vld [vmem:[%s1485_s1 + $0x18] sm:$0xff]  ;;  %vm61_vm0 = vcmask 64512  }
  0x13   :  { %129 = vmatprep.mubr.f32.mxu0 %v1096_v0  ;;  %200 = vmatprep.mubr.f32.mxu1 %v1096_v0  ;;  %v35_v3 = vld [vmem:[%s1485_s1] sm:$0xff]  ;;  %v37_v4 = vld [vmem:[%s1485_s1 + $0x10] sm:$0xff]  ;;  %v636_v7 = vld [vmem:[#allocation2 + $0x88] sm:$0xff] }
  0x14   :  { %65 = vmatprep.subr.mxu0 %v36_v1  ;;  %136 = vmatprep.subr.mxu1 %v38_v2  ;;  %v34_v5 = vld [vmem:[%s1484_s0] sm:$0xff]  ;;  %v668_v10 = vld [vmem:[#allocation2 + $0x188] sm:$0xff]  ;;  %v637_v17 = vld [vmem:[#allocation2 + $0x90] sm:$0xff] }
  0x15   :  { %66 = vmatpush1.msra.mxu0 %v35_v3  ;;  %137 = vmatpush1.msra.mxu1 %v37_v4  ;;  %v635_v6 = vld [vmem:[#allocation2 + $0x80] sm:$0xff]  ;;  %v620_v12 = vld [vmem:[#allocation2 + $0x8] sm:$0xff]  ;;  %v638_v19 = vld [vmem:[#allocation2 + $0x98] sm:$0xff] }
  0x16   :  { %870 = vmatmul.mubr.msk.f32.vlgmr.msra.gmra.mrb[0].mxu0 %vm61_vm0, %v34_v5  ;;  %871 = vmatmul.mubr.msk.f32.vlgmr.msra.gmra.mrb[0].mxu1 %vm61_vm0, %v34_v5  ;;  %v667_v8 = vld [vmem:[#allocation2 + $0x180] sm:$0xff]  ;;  %v959_v9 = vpack.c.bf16 %v636_v7, %v635_v6  ;;  %v652_v16 = vld [vmem:[#allocation2 + $0x108] sm:$0xff]  ;;  %v669_v20 = vld [vmem:[#allocation2 + $0x190] sm:$0xff]  ;;  %v963_v22 = vpack.c.bf16 %v638_v19, %v637_v17 }
  0x17   :  { %v619_v11 = vld [vmem:[#allocation2] sm:$0xff]  ;;  %v991_v13 = vpack.c.bf16 %v668_v10, %v667_v8  ;;  %v670_v21 = vld [vmem:[#allocation2 + $0x198] sm:$0xff]  ;;  %v621_v24 = vld [vmem:[#allocation2 + $0x10] sm:$0xff] }
  0x18   :  { %v961_v14 = vpack.c.bf16 %v620_v12, %v619_v11  ;;  %v651_v15 = vld [vmem:[#allocation2 + $0x100] sm:$0xff]  ;;  %960 = vmatprep.subr.bf16.mxu0 %v959_v9  ;;  %v995_v23 = vpack.c.bf16 %v670_v21, %v669_v20  ;;  %v622_v25 = vld [vmem:[#allocation2 + $0x18] sm:$0xff]  ;;  %v653_v26 = vld [vmem:[#allocation2 + $0x110] sm:$0xff] }
  0x19   :  { %v993_v18 = vpack.c.bf16 %v652_v16, %v651_v15  ;;  %992 = vmatprep.subr.bf16.mxu1 %v991_v13  ;;  %v965_v27 = vpack.c.bf16 %v622_v25, %v621_v24  ;;  %v654_v28 = vld [vmem:[#allocation2 + $0x118] sm:$0xff]  ;;  %v639_v29 = vld [vmem:[#allocation2 + $0xa0] sm:$0xff]  ;;  %v640_v30 = vld [vmem:[#allocation2 + $0xa8] sm:$0xff] }
  0x1a   :  { %962 = vmatpush3.bf16.msra.mxu0 %v961_v14  ;;  %v997_v31 = vpack.c.bf16 %v654_v28, %v653_v26  ;;  %v967_v32 = vpack.c.bf16 %v640_v30, %v639_v29  ;;  %v671_v33 = vld [vmem:[#allocation2 + $0x1a0] sm:$0xff]  ;;  %v672_v34 = vld [vmem:[#allocation2 + $0x1a8] sm:$0xff]  ;;  %v641_v41 = vld [vmem:[#allocation2 + $0xb0] sm:$0xff] }
  0x1b   :  { %994 = vmatpush3.bf16.msra.mxu1 %v993_v18  ;;  %964 = vmatprep.subr.bf16.mxu0 %v963_v22  ;;  %v623_v35 = vld [vmem:[#allocation2 + $0x20] sm:$0xff]  ;;  %v999_v36 = vpack.c.bf16 %v672_v34, %v671_v33  ;;  %v624_v37 = vld [vmem:[#allocation2 + $0x28] sm:$0xff]  ;;  %v642_v42 = vld [vmem:[#allocation2 + $0xb8] sm:$0xff] }
  0x1c   :  { %996 = vmatprep.subr.bf16.mxu1 %v995_v23  ;;  %v655_v38 = vld [vmem:[#allocation2 + $0x120] sm:$0xff]  ;;  %v656_v39 = vld [vmem:[#allocation2 + $0x128] sm:$0xff]  ;;  %v969_v40 = vpack.c.bf16 %v624_v37, %v623_v35  ;;  %v673_v43 = vld [vmem:[#allocation2 + $0x1b0] sm:$0xff]  ;;  %v971_v45 = vpack.c.bf16 %v642_v42, %v641_v41 }
  0x1d   :  { %v1001_v44 = vpack.c.bf16 %v656_v39, %v655_v38  ;;  %v674_v46 = vld [vmem:[#allocation2 + $0x1b8] sm:$0xff]  ;;  %v625_v47 = vld [vmem:[#allocation2 + $0x30] sm:$0xff]  ;;  %v643_v52 = vld [vmem:[#allocation2 + $0xc0] sm:$0xff]  ;;  %v41_v38 = vlaneseq }
  0x1e   :  { %966 = vmatpush3.bf16.msra.mxu0 %v965_v27  ;;  %v626_v48 = vld [vmem:[#allocation2 + $0x38] sm:$0xff]  ;;  %v1003_v49 = vpack.c.bf16 %v674_v46, %v673_v43  ;;  %v657_v50 = vld [vmem:[#allocation2 + $0x130] sm:$0xff]  ;;  %v644_v53 = vld [vmem:[#allocation2 + $0xc8] sm:$0xff] }
  0x1f   :  { %998 = vmatpush3.bf16.msra.mxu1 %v997_v31  ;;  %968 = vmatprep.subr.bf16.mxu0 %v967_v32  ;;  %v658_v51 = vld [vmem:[#allocation2 + $0x138] sm:$0xff]  ;;  %v675_v54 = vld [vmem:[#allocation2 + $0x1c0] sm:$0xff]  ;;  %v676_v55 = vld [vmem:[#allocation2 + $0x1c8] sm:$0xff]  ;;  %v973_v56 = vpack.c.bf16 %v626_v48, %v625_v47  ;;  %v975_v58 = vpack.c.bf16 %v644_v53, %v643_v52  ;;  %v42_v39 = vshrl.u32 %v41_v38, 7 }
  0x20   :  { %1000 = vmatprep.subr.bf16.mxu1 %v999_v36  ;;  %v1005_v57 = vpack.c.bf16 %v658_v51, %v657_v50  ;;  %v627_v59 = vld [vmem:[#allocation2 + $0x40] sm:$0xff]  ;;  %v628_v60 = vld [vmem:[#allocation2 + $0x48] sm:$0xff]  ;;  %v1007_v62 = vpack.c.bf16 %v676_v55, %v675_v54  ;;  %v645_v0 = vld [vmem:[#allocation2 + $0xd0] sm:$0xff] }
  0x21   :  { %v659_v61 = vld [vmem:[#allocation2 + $0x140] sm:$0xff]  ;;  %v660_v63 = vld [vmem:[#allocation2 + $0x148] sm:$0xff]  ;;  %v646_v1 = vld [vmem:[#allocation2 + $0xd8] sm:$0xff]  ;;  %v977_v4 = vpack.c.bf16 %v628_v60, %v627_v59  ;;  %v51_v41 = vsub.s32 2, %v42_v39  ;;  %v47_v43 = vsub.s32 1, %v42_v39 }
  0x22   :  { %970 = vmatpush3.bf16.msra.mxu0 %v969_v40  ;;  %v677_v2 = vld [vmem:[#allocation2 + $0x1d0] sm:$0xff]  ;;  %v678_v3 = vld [vmem:[#allocation2 + $0x1d8] sm:$0xff]  ;;  %v1009_v5 = vpack.c.bf16 %v660_v63, %v659_v61  ;;  %v979_v6 = vpack.c.bf16 %v646_v1, %v645_v0  ;;  %v647_v12 = vld [vmem:[#allocation2 + $0xe0] sm:$0xff]  ;;  %v43_v40 = vsub.s32 0, %v42_v39 }
  0x23   :  { %1002 = vmatpush3.bf16.msra.mxu1 %v1001_v44  ;;  %972 = vmatprep.subr.bf16.mxu0 %v971_v45  ;;  %v629_v7 = vld [vmem:[#allocation2 + $0x50] sm:$0xff]  ;;  %v630_v8 = vld [vmem:[#allocation2 + $0x58] sm:$0xff]  ;;  %v1011_v10 = vpack.c.bf16 %v678_v3, %v677_v2  ;;  %v648_v13 = vld [vmem:[#allocation2 + $0xe8] sm:$0xff]  ;;  %v55_v44 = vsub.s32 3, %v42_v39 }
  0x24   :  { %1004 = vmatprep.subr.bf16.mxu1 %v1003_v49  ;;  %v661_v9 = vld [vmem:[#allocation2 + $0x150] sm:$0xff]  ;;  %v662_v11 = vld [vmem:[#allocation2 + $0x158] sm:$0xff]  ;;  %v679_v14 = vld [vmem:[#allocation2 + $0x1e0] sm:$0xff]  ;;  %v981_v16 = vpack.c.bf16 %v630_v8, %v629_v7  ;;  %v983_v18 = vpack.c.bf16 %v648_v13, %v647_v12 }
  0x25   :  { %v680_v15 = vld [vmem:[#allocation2 + $0x1e8] sm:$0xff]  ;;  %v1013_v17 = vpack.c.bf16 %v662_v11, %v661_v9  ;;  %v631_v19 = vld [vmem:[#allocation2 + $0x60] sm:$0xff]  ;;  %v649_v24 = vld [vmem:[#allocation2 + $0xf0] sm:$0xff] }
  0x26   :  { %974 = vmatpush3.bf16.msra.mxu0 %v973_v56  ;;  %v632_v20 = vld [vmem:[#allocation2 + $0x68] sm:$0xff]  ;;  %v663_v21 = vld [vmem:[#allocation2 + $0x160] sm:$0xff]  ;;  %v1015_v22 = vpack.c.bf16 %v680_v15, %v679_v14  ;;  %v650_v25 = vld [vmem:[#allocation2 + $0xf8] sm:$0xff] }
  0x27   :  { %1006 = vmatpush3.bf16.msra.mxu1 %v1005_v57  ;;  %976 = vmatprep.subr.bf16.mxu0 %v975_v58  ;;  %v664_v23 = vld [vmem:[#allocation2 + $0x168] sm:$0xff]  ;;  %v681_v26 = vld [vmem:[#allocation2 + $0x1f0] sm:$0xff]  ;;  %v682_v27 = vld [vmem:[#allocation2 + $0x1f8] sm:$0xff]  ;;  %v985_v28 = vpack.c.bf16 %v632_v20, %v631_v19  ;;  %v987_v30 = vpack.c.bf16 %v650_v25, %v649_v24  ;;  %v1097_v24 = vmov 683565275  }
  0x28   :  { %1008 = vmatprep.subr.bf16.mxu1 %v1007_v62  ;;  %v1017_v29 = vpack.c.bf16 %v664_v23, %v663_v21  ;;  %v633_v31 = vld [vmem:[#allocation2 + $0x70] sm:$0xff]  ;;  %v634_v32 = vld [vmem:[#allocation2 + $0x78] sm:$0xff]  ;;  %v1019_v33 = vpack.c.bf16 %v682_v27, %v681_v26  ;;  %v39_v42 = vld [vmem:[%s1486_s2] sm:$0xf] }
  0x29   :  { %v665_v34 = vld [vmem:[#allocation2 + $0x170] sm:$0xff]  ;;  %v666_v35 = vld [vmem:[#allocation2 + $0x178] sm:$0xff]  ;;  %v989_v36 = vpack.c.bf16 %v634_v32, %v633_v31  ;;  %v44_v45 = vrot.slane %v39_v42, %v43_v40  ;;  %v52_v46 = vrot.slane %v39_v42, %v51_v41  ;;  %v48_v47 = vrot.slane %v39_v42, %v47_v43 }
  0x2a   :  { %978 = vmatpush3.bf16.msra.mxu0 %v977_v4  ;;  %v1021_v37 = vpack.c.bf16 %v666_v35, %v665_v34  ;;  %v56_v48 = vrot.slane %v39_v42, %v55_v44  ;;  %v1100_v32 = vmov 2102212464   ;;  %v1101_v34 = vmov 920167782  }
  0x2b   :  { %1010 = vmatpush3.bf16.msra.mxu1 %v1009_v5  ;;  %980 = vmatprep.subr.bf16.mxu0 %v979_v6  ;;  %v1102_v42 = vmov 1326507024  }
  0x2c   :  { %1012 = vmatprep.subr.bf16.mxu1 %v1011_v10 }
  0x2e   :  { %982 = vmatpush3.bf16.msra.mxu0 %v981_v16 }
  0x2f   :  { %1014 = vmatpush3.bf16.msra.mxu1 %v1013_v17  ;;  %984 = vmatprep.subr.bf16.mxu0 %v983_v18 }
  0x30   :  { %1016 = vmatprep.subr.bf16.mxu1 %v1015_v22 }
  0x32   :  { %986 = vmatpush3.bf16.msra.mxu0 %v985_v28  ;;  %v1098_v28 = vmov 2475754826  }
  0x33   :  { %1018 = vmatpush3.bf16.msra.mxu1 %v1017_v29  ;;  %988 = vmatprep.subr.bf16.mxu0 %v987_v30  ;;  %v1099_v30 = vmov 2131351028  }
  0x34   :  { %1020 = vmatprep.subr.bf16.mxu1 %v1019_v33 }
  0x36   :  { %990 = vmatpush3.bf16.msra.mxu0 %v989_v36 }
  0x37   :  { %1022 = vmatpush3.bf16.msra.mxu1 %v1021_v37 }
  0xe9   :  { %v131_v49 = vpop.f32.mrb[0].mxu0  ;;  %v202_v50 = vpop.f32.mrb[0].mxu1 }
  0xea   :  { %v1164_v51 = vadd.f32 %v131_v49, %v44_v45  ;;  %v1166_v52 = vadd.f32 %v202_v50, %v52_v46  ;;  %v133_v53 = vpop.f32.mrb[1].mxu0  ;;  %v204_v54 = vpop.f32.mrb[1].mxu1 }
  0xeb   :  { %v1168_v55 = vadd.f32 %v133_v53, %v48_v47  ;;  %v1170_v56 = vadd.f32 %v204_v54, %v56_v48 }
  0xec   :  { %v207_v57 = vand.u32 2147483647, %v1164_v51  ;;  %v210_v58 = vand.u32 2139095040, %v1164_v51  ;;  %v413_v59 = vand.u32 2147483647, %v1166_v52  ;;  %v416_v60 = vand.u32 2139095040, %v1166_v52 }
  0xed   :  { %v313_v61 = vand.u32 2139095040, %v1168_v55  ;;  %v519_v62 = vand.u32 2139095040, %v1170_v56 }
  0xee   :  { %v211_v63 = vshrl.u32 %v210_v58, 23  ;;  %v214_v0 = vand.u32 8388607, %v207_v57  ;;  %v417_v1 = vshrl.u32 %v416_v60, 23  ;;  %v420_v2 = vand.u32 8388607, %v413_v59 }
  0xef   :  { %v314_v3 = vshrl.u32 %v313_v61, 23  ;;  %v520_v4 = vshrl.u32 %v519_v62, 23 }
  0xf0   :  { %v872_v5 = vadd.s32 4294967169, %v211_v63  ;;  %v880_v6 = vadd.s32 4294967169, %v417_v1  ;;  %v215_v8 = vor.u32 8388608, %v214_v0  ;;  %v421_v10 = vor.u32 8388608, %v420_v2 }
  0xf1   :  { %v876_v7 = vadd.s32 4294967169, %v314_v3  ;;  %v884_v13 = vadd.s32 4294967169, %v520_v4 }
  0xf2   :  { %v217_v9 = vadd.s32 1, %v872_v5  ;;  %v423_v11 = vadd.s32 1, %v880_v6  ;;  %v1184_v19 = vshll.u32 %v215_v8, 8  ;;  %v1188_v21 = vshll.u32 %v421_v10, 8 }
  0xf3   :  { %v320_v12 = vadd.s32 1, %v876_v7  ;;  %v1190_v22 = vadd.s32 1, %v884_v13 }
  0xf4   :  { %vm218_vm1 = vcmp.gt.s32.totalorder %v217_v9, 0  ;;  %vm424_vm2 = vcmp.gt.s32.totalorder %v423_v11, 0 }
  0xf5   :  { %v219_v14 = vsel %vm218_vm1, %v217_v9, 0  ;;  %vm321_vm3 = vcmp.gt.s32.totalorder %v320_v12, 0  ;;  %v425_v17 = vsel %vm424_vm2, %v423_v11, 0  ;;  %vm527_vm13 = vcmp.gt.s32.totalorder %v1190_v22, 0 }
  0xf6   :  { %v220_v15 = vshrl.u32 %v219_v14, 5  ;;  %v221_v16 = vand.u32 31, %v219_v14  ;;  %v1182_v18 = vsel %vm321_vm3, %v320_v12, 0  ;;  %v1186_v20 = vshrl.u32 %v425_v17, 5 }
  0xf7   :  { %v427_v26 = vand.u32 31, %v425_v17  ;;  %v1194_v27 = vand.u32 31, %v1182_v18 }
  0xf8   :  { %v222_v23 = vsub.s32 32, %v221_v16  ;;  %v224_v25 = vshll.u32 %v1097_v24, %v221_v16  ;;  %v227_v29 = vshll.u32 %v1098_v28, %v221_v16  ;;  %v230_v31 = vshll.u32 %v1099_v30, %v221_v16 }
  0xf9   :  { %v233_v33 = vshll.u32 %v1100_v32, %v221_v16  ;;  %v236_v35 = vshll.u32 %v1101_v34, %v221_v16  ;;  %vm239_vm4 = vcmp.lt.s32.totalorder %v220_v15, 1  ;;  %vm240_vm5 = vcmp.lt.s32.totalorder %v220_v15, 2 }
  0xfa   :  { %v225_v36 = vshrl.u32 %v1098_v28, %v222_v23  ;;  %v228_v37 = vshrl.u32 %v1099_v30, %v222_v23  ;;  %v231_v39 = vshrl.u32 %v1100_v32, %v222_v23  ;;  %v223_v40 = vshrl.u32 %v1097_v24, %v222_v23 }
  0xfb   :  { %v234_v41 = vshrl.u32 %v1101_v34, %v222_v23  ;;  %v237_v43 = vshrl.u32 %v1102_v42, %v222_v23  ;;  %v428_v47 = vsub.s32 32, %v427_v26  ;;  %vm241_vm6 = vcmp.lt.s32.totalorder %v220_v15, 3 }
  0xfc   :  { %v226_v44 = vor.u32 %v225_v36, %v224_v25  ;;  %v229_v45 = vor.u32 %v228_v37, %v227_v29  ;;  %v232_v46 = vor.u32 %v231_v39, %v230_v31  ;;  %vm242_vm7 = vcmp.lt.s32.totalorder %v220_v15, 4 }
  0xfd   :  { %v235_v48 = vor.u32 %v234_v41, %v233_v33  ;;  %v238_v49 = vor.u32 %v237_v43, %v236_v35  ;;  %v430_v63 = vshll.u32 %v1097_v24, %v427_v26  ;;  %v431_v2 = vshrl.u32 %v1098_v28, %v428_v47 }
  0xfe   :  { %v243_v50 = vsel %vm239_vm4, %v223_v40, %v226_v44  ;;  %v244_v53 = vsel %vm242_vm7, %v232_v46, 2102212464  ;;  %v247_v54 = vsel %vm239_vm4, %v226_v44, %v229_v45  ;;  %v251_v58 = vsel %vm239_vm4, %v229_v45, %v232_v46 }
  0xff   :  { %v245_v60 = vsel %vm241_vm6, %v229_v45, %v244_v53  ;;  %v248_v61 = vsel %vm242_vm7, %v235_v48, 920167782  ;;  %v252_v62 = vsel %vm242_vm7, %v238_v49, 1326507024  ;;  %v433_v3 = vshll.u32 %v1098_v28, %v427_v26 }
 0x100   :  { %v249_v0 = vsel %vm241_vm6, %v232_v46, %v248_v61  ;;  %v253_v1 = vsel %vm241_vm6, %v235_v48, %v252_v62  ;;  %v246_v4 = vsel %vm240_vm5, %v243_v50, %v245_v60  ;;  %v434_v7 = vshrl.u32 %v1099_v30, %v428_v47 }
 0x101   :  { %v250_v5 = vsel %vm240_vm5, %v247_v54, %v249_v0  ;;  %v254_v6 = vsel %vm240_vm5, %v251_v58, %v253_v1  ;;  %v432_v12 = vor.u32 %v431_v2, %v430_v63  ;;  %v436_v14 = vshll.u32 %v1099_v30, %v427_v26 }
 0x102   :  { %v1217_v8 = vmul.u32.u64.low %v1184_v19, %v254_v6  ;;  %v1218_v9 = vmul.u32.u64.high %v1184_v19, %v254_v6, %v1217_v8  ;;  %v1221_v10 = vmul.u32.u64.low %v1184_v19, %v250_v5  ;;  %v1222_v11 = vmul.u32.u64.high %v1184_v19, %v250_v5, %v1221_v10 }
 0x103   :  { %v435_v13 = vor.u32 %v434_v7, %v433_v3  ;;  %v437_v16 = vshrl.u32 %v1100_v32, %v428_v47  ;;  %v429_v15 = vshrl.u32 %v1097_v24, %v428_v47  ;;  %v439_v17 = vshll.u32 %v1100_v32, %v427_v26 }
 0x104   :  { %v440_v23 = vshrl.u32 %v1101_v34, %v428_v47  ;;  %v443_v25 = vshrl.u32 %v1102_v42, %v428_v47  ;;  %v262_v29 = vmul.u32 %v1184_v19, %v246_v4  ;;  %v442_v33 = vshll.u32 %v1101_v34, %v427_v26 }
 0x105   :  { %v438_v31 = vor.u32 %v437_v16, %v436_v14  ;;  %vm445_vm8 = vcmp.lt.s32.totalorder %v1186_v20, 1  ;;  %vm264_vm9 = vc.u32 %v1218_v9, %v1221_v10  ;;  %v265_v35 = vadd.s32 1, %v1222_v11 }
 0x106   :  { %v441_v36 = vor.u32 %v440_v23, %v439_v17  ;;  %vm446_vm10 = vcmp.lt.s32.totalorder %v1186_v20, 2  ;;  %v444_v37 = vor.u32 %v443_v25, %v442_v33  ;;  %vm447_vm11 = vcmp.lt.s32.totalorder %v1186_v20, 3 }
 0x107   :  { %vm448_vm12 = vcmp.lt.s32.totalorder %v1186_v20, 4  ;;  %v453_v39 = vsel %vm445_vm8, %v432_v12, %v435_v13  ;;  %v266_v19 = vsel %vm264_vm9, %v265_v35, %v1222_v11  ;;  %v457_v41 = vsel %vm445_vm8, %v435_v13, %v438_v31 }
 0x108   :  { %v450_v40 = vsel %vm448_vm12, %v438_v31, 2102212464  ;;  %v454_v26 = vsel %vm448_vm12, %v441_v36, 920167782  ;;  %v267_v43 = vadd.s32 %v266_v19, %v262_v29  ;;  %v449_v44 = vsel %vm445_vm8, %v429_v15, %v432_v12 }
 0x109   :  { %v455_v45 = vsel %vm447_vm11, %v438_v31, %v454_v26  ;;  %v458_v46 = vsel %vm448_vm12, %v444_v37, 1326507024  ;;  %v451_v47 = vsel %vm447_vm11, %v435_v13, %v450_v40  ;;  %v325_v50 = vsub.s32 32, %v1194_v27 }
 0x10a   :  { %v456_v48 = vsel %vm446_vm10, %v453_v39, %v455_v45  ;;  %v459_v49 = vsel %vm447_vm11, %v441_v36, %v458_v46  ;;  %v268_v53 = vadd.s32 536870912, %v267_v43  ;;  %v452_v0 = vsel %vm446_vm10, %v449_v44, %v451_v47 }
 0x10b   :  { %v460_v54 = vsel %vm446_vm10, %v457_v41, %v459_v49  ;;  %v1247_v58 = vmul.u32.u64.low %v1188_v21, %v456_v48  ;;  %v1248_v60 = vmul.u32.u64.high %v1188_v21, %v456_v48, %v1247_v58  ;;  %v310_v1 = vand.u32 2147483647, %v1168_v55 }
 0x10c   :  { %v1252_v61 = vmul.u32.u64.low %v1188_v21, %v460_v54  ;;  %v1253_v62 = vmul.u32.u64.high %v1188_v21, %v460_v54, %v1252_v61  ;;  %v1255_v63 = vshrl.u32 %v268_v53, 30  ;;  %v337_v4 = vshrl.u32 %v1101_v34, %v325_v50 }
 0x10d   :  { %v471_v3 = vadd.s32 1, %v1248_v60  ;;  %v340_v5 = vshrl.u32 %v1102_v42, %v325_v50  ;;  %v468_v6 = vmul.u32 %v1188_v21, %v452_v0  ;;  %v336_v20 = vshll.u32 %v1100_v32, %v1194_v27 }
 0x10e   :  { %v270_v2 = vshll.u32 %v1255_v63, 30  ;;  %vm470_vm14 = vc.u32 %v1253_v62, %v1247_v58  ;;  %v339_v11 = vshll.u32 %v1101_v34, %v1194_v27  ;;  %v528_v12 = vsel %vm527_vm13, %v1190_v22, 0 }
 0x10f   :  { %v472_v8 = vsel %vm470_vm14, %v471_v3, %v1248_v60  ;;  %v323_v14 = vshrl.u32 %v1182_v18, 5  ;;  %v317_v21 = vand.u32 8388607, %v310_v1  ;;  %v327_v16 = vshll.u32 %v1097_v24, %v1194_v27 }
 0x110   :  { %v1270_v7 = vsub.s32 %v267_v43, %v270_v2  ;;  %v473_v13 = vadd.s32 %v472_v8, %v468_v6  ;;  %v338_v17 = vor.u32 %v337_v4, %v336_v20  ;;  %v341_v23 = vor.u32 %v340_v5, %v339_v11 }
 0x111   :  { %v328_v25 = vshrl.u32 %v1098_v28, %v325_v50  ;;  %v1283_v31 = vand.u32 31, %v528_v12  ;;  %v330_v22 = vshll.u32 %v1098_v28, %v1194_v27  ;;  %v331_v18 = vshrl.u32 %v1099_v30, %v325_v50 }
 0x112   :  { %v273_v15 = vsub.s32 0, %v1270_v7  ;;  %v474_v29 = vadd.s32 536870912, %v473_v13  ;;  %v333_v36 = vshll.u32 %v1099_v30, %v1194_v27  ;;  %v334_v37 = vshrl.u32 %v1100_v32, %v325_v50 }
 0x113   :  { %v329_v35 = vor.u32 %v328_v25, %v327_v16  ;;  %vm345_vm15 = vcmp.lt.s32.totalorder %v323_v14, 4  ;;  %v332_v19 = vor.u32 %v331_v18, %v330_v22  ;;  %v318_v41 = vor.u32 8388608, %v317_v21 }
 0x114   :  { %v873_v33 = vmin.u32 %v273_v15, %v1270_v7  ;;  %v1292_v39 = vshrl.u32 %v474_v29, 30  ;;  %v351_v26 = vsel %vm345_vm15, %v338_v17, 920167782  ;;  %v335_v43 = vor.u32 %v334_v37, %v333_v36 }
 0x115   :  { %v355_v45 = vsel %vm345_vm15, %v341_v23, 1326507024  ;;  %v1296_v46 = vsub.s32 32, %v1283_v31  ;;  %vm342_vm0 = vcmp.lt.s32.totalorder %v323_v14, 1  ;;  %vm343_vm1 = vcmp.lt.s32.totalorder %v323_v14, 2 }
 0x116   :  { %v275_v40 = vclz %v873_v33  ;;  %v476_v44 = vshll.u32 %v1292_v39, 30  ;;  %vm344_vm2 = vcmp.lt.s32.totalorder %v323_v14, 3  ;;  %v350_v27 = vsel %vm342_vm0, %v329_v35, %v332_v19 }
 0x117   :  { %v347_v49 = vsel %vm345_vm15, %v335_v43, 2102212464  ;;  %v352_v53 = vsel %vm344_vm2, %v335_v43, %v351_v26  ;;  %v354_v54 = vsel %vm342_vm0, %v332_v19, %v335_v43  ;;  %v326_v60 = vshrl.u32 %v1097_v24, %v325_v50 }
 0x118   :  { %v874_v47 = vadd.s32 4294967294, %v275_v40  ;;  %v1299_v48 = vsub.s32 %v473_v13, %v476_v44  ;;  %v353_v61 = vsel %vm343_vm1, %v350_v27, %v352_v53  ;;  %v356_v0 = vsel %vm344_vm2, %v338_v17, %v355_v45 }
 0x119   :  { %v357_v4 = vsel %vm343_vm1, %v354_v54, %v356_v0  ;;  %v358_v5 = vshll.u32 %v318_v41, 8  ;;  %v543_v20 = vshrl.u32 %v1101_v34, %v1296_v46  ;;  %v346_v8 = vsel %vm342_vm0, %v326_v60, %v329_v35 }
 0x11a   :  { %vm875_vm3 = vcmp.lt.s32.totalorder %v874_v47, 0  ;;  %v479_v3 = vsub.s32 0, %v1299_v48  ;;  %v348_v11 = vsel %vm344_vm2, %v332_v19, %v347_v49  ;;  %v546_v13 = vshrl.u32 %v1102_v42, %v1296_v46 }
 0x11b   :  { %v278_v2 = vsel %vm875_vm3, 0, %v874_v47  ;;  %v1315_v21 = vmul.u32.u64.low %v358_v5, %v357_v4  ;;  %v1316_v16 = vmul.u32.u64.high %v358_v5, %v357_v4, %v1315_v21  ;;  %v542_v15 = vshll.u32 %v1100_v32, %v1283_v31 }
 0x11c   :  { %v283_v6 = vsub.s32 4294967266, %v278_v2  ;;  %v881_v50 = vmin.u32 %v479_v3, %v1299_v48  ;;  %v1320_v17 = vmul.u32.u64.low %v358_v5, %v353_v61  ;;  %v1321_v23 = vmul.u32.u64.high %v358_v5, %v353_v61, %v1320_v17 }
 0x11d   :  { %v516_v25 = vand.u32 2147483647, %v1170_v56  ;;  %v545_v18 = vshll.u32 %v1101_v34, %v1283_v31  ;;  %v349_v33 = vsel %vm343_vm1, %v346_v8, %v348_v11  ;;  %v263_v42 = vadd.s32 %v1221_v10, %v1218_v9 }
 0x11e   :  { %v284_v29 = vadd.s32 127, %v283_v6  ;;  %v481_v22 = vclz %v881_v50  ;;  %v1330_v35 = vshrl.u32 %v528_v12, 5  ;;  %v544_v36 = vor.u32 %v543_v20, %v542_v15 }
 0x11f   :  { %v279_v37 = vsub.s32 32, %v278_v2  ;;  %v547_v40 = vor.u32 %v546_v13, %v545_v18  ;;  %vm367_vm4 = vc.u32 %v1316_v16, %v1320_v17  ;;  %v365_v26 = vmul.u32 %v358_v5, %v349_v33 }
 0x120   :  { %v882_v19 = vadd.s32 4294967294, %v481_v22  ;;  %v368_v41 = vadd.s32 1, %v1321_v23  ;;  %v523_v34 = vand.u32 8388607, %v516_v25  ;;  %v534_v14 = vshrl.u32 %v1098_v28, %v1296_v46 }
 0x121   :  { %v285_v43 = vshll.u32 %v284_v29, 23  ;;  %v533_v9 = vshll.u32 %v1097_v24, %v1283_v31  ;;  %v537_v10 = vshrl.u32 %v1099_v30, %v1296_v46  ;;  %v540_v12 = vshrl.u32 %v1100_v32, %v1296_v46 }
 0x122   :  { %vm883_vm5 = vcmp.lt.s32.totalorder %v882_v19, 0  ;;  %v369_v44 = vsel %vm367_vm4, %v368_v41, %v1321_v23  ;;  %v536_v45 = vshll.u32 %v1098_v28, %v1283_v31  ;;  %v539_v47 = vshll.u32 %v1099_v30, %v1283_v31 }
 0x123   :  { %v281_v27 = vshrl.u32 %v263_v42, %v279_v37  ;;  %vm551_vm6 = vcmp.lt.s32.totalorder %v1330_v35, 4  ;;  %v370_v49 = vadd.s32 %v369_v44, %v365_v26  ;;  %v535_v54 = vor.u32 %v534_v14, %v533_v9 }
 0x124   :  { %v557_v53 = vsel %vm551_vm6, %v544_v36, 920167782  ;;  %v538_v60 = vor.u32 %v537_v10, %v536_v45  ;;  %v541_v61 = vor.u32 %v540_v12, %v539_v47  ;;  %v280_v32 = vshll.u32 %v1270_v7, %v278_v2 }
 0x125   :  { %v286_v0 = vor.u32 4788187, %v285_v43  ;;  %v484_v3 = vsel %vm883_vm5, 0, %v882_v19  ;;  %v371_v4 = vadd.s32 536870912, %v370_v49  ;;  %v561_v28 = vsel %vm551_vm6, %v547_v40, 1326507024 }
 0x126   :  { %v524_v5 = vor.u32 8388608, %v523_v34  ;;  %v282_v30 = vor.u32 %v281_v27, %v280_v32  ;;  %vm548_vm7 = vcmp.lt.s32.totalorder %v1330_v35, 1  ;;  %vm550_vm8 = vcmp.lt.s32.totalorder %v1330_v35, 3 }
 0x127   :  { %v1356_v31 = vshrl.u32 %v371_v4, 30  ;;  %v489_v6 = vsub.s32 4294967266, %v484_v3  ;;  %v556_v20 = vsel %vm548_vm7, %v535_v54, %v538_v60  ;;  %v558_v7 = vsel %vm550_vm8, %v541_v61, %v557_v53 }
 0x128   :  { %v560_v2 = vsel %vm548_vm7, %v538_v60, %v541_v61  ;;  %v287_v8 = vand.u32 2147483647, %v286_v0  ;;  %v532_v50 = vshrl.u32 %v1097_v24, %v1296_v46  ;;  %vm549_vm9 = vcmp.lt.s32.totalorder %v1330_v35, 2 }
 0x129   :  { %v373_v11 = vshll.u32 %v1356_v31, 30  ;;  %v553_v13 = vsel %vm551_vm6, %v541_v61, 2102212464  ;;  %v562_v21 = vsel %vm550_vm8, %v544_v36, %v561_v28  ;;  %v564_v15 = vshll.u32 %v524_v5, 8 }
 0x12a   :  { %v289_v23 = vcvt.s32.f32 %v282_v30  ;;  %v559_v22 = vsel %vm549_vm9, %v556_v20, %v558_v7  ;;  %v563_v18 = vsel %vm549_vm9, %v560_v2, %v562_v21  ;;  %v490_v33 = vadd.s32 127, %v489_v6 }
 0x12b   :  { %v374_v29 = vsub.s32 %v370_v49, %v373_v11  ;;  %v1378_v42 = vmul.u32.u64.low %v564_v15, %v563_v18  ;;  %v1379_v24 = vmul.u32.u64.high %v564_v15, %v563_v18, %v1378_v42  ;;  %v552_v19 = vsel %vm548_vm7, %v532_v50, %v535_v54 }
 0x12c   :  { %v290_v46 = vmul.f32 %v289_v23, %v287_v8  ;;  %v554_v36 = vsel %vm550_vm8, %v538_v60, %v553_v13  ;;  %v485_v40 = vsub.s32 32, %v484_v3  ;;  %v469_v14 = vadd.s32 %v1247_v58, %v1253_v62 }
 0x12d   :  { %v376_v37 = vsub.s32 0, %v374_v29  ;;  %v1385_v26 = vmul.u32.u64.low %v564_v15, %v559_v22  ;;  %v1386_v41 = vmul.u32.u64.high %v564_v15, %v559_v22, %v1385_v26  ;;  %v491_v43 = vshll.u32 %v490_v33, 23 }
 0x12e   :  { %v555_v9 = vsel %vm549_vm9, %v552_v19, %v554_v36  ;;  %v291_v10 = vxor.u32 2147483648, %v290_v46  ;;  %v487_v44 = vshrl.u32 %v469_v14, %v485_v40  ;;  %vm209_vm11 = vcmp.lt.s32.totalorder %v1164_v51, 0 }
 0x12f   :  { %v877_v34 = vmin.u32 %v376_v37, %v374_v29  ;;  %vm573_vm10 = vc.u32 %v1379_v24, %v1385_v26  ;;  %v574_v45 = vadd.s32 1, %v1386_v41  ;;  %v571_v27 = vmul.u32 %v564_v15, %v555_v9 }
 0x130   :  { %v486_v49 = vshll.u32 %v1299_v48, %v484_v3  ;;  %v492_v53 = vor.u32 4788187, %v491_v43  ;;  %v292_v62 = vsel %vm209_vm11, %v291_v10, %v290_v46  ;;  %v366_v60 = vadd.s32 %v1320_v17, %v1316_v16 }
 0x131   :  { %v378_v12 = vclz %v877_v34  ;;  %v575_v58 = vsel %vm573_vm10, %v574_v45, %v1386_v41  ;;  %vm1405_vm13 = vcmp.le.f32.partialorder %v207_v57, 0.7853982  ;;  %v293_v50 = vsub.s32 4, %v1255_v63 }
 0x132   :  { %v576_v35 = vadd.s32 %v575_v58, %v571_v27  ;;  %v488_v54 = vor.u32 %v487_v44, %v486_v49  ;;  %v493_v3 = vand.u32 2147483647, %v492_v53  ;;  %v295_v28 = vsel %vm1405_vm13, %v1164_v51, %v292_v62 }
 0x133   :  { %v878_v47 = vadd.s32 4294967294, %v378_v12  ;;  %1049 = vcosq.f32 %v295_v28  ;;  %v396_v18 = vsub.s32 4, %v1356_v31  ;;  %v294_v33 = vsel %vm209_vm11, %v293_v50, %v1255_v63 }
 0x134   :  { %v577_v4 = vadd.s32 536870912, %v576_v35  ;;  %v495_v16 = vcvt.s32.f32 %v488_v54  ;;  %1051 = vsinq.f32 %v295_v28  ;;  %vm415_vm14 = vcmp.lt.s32.totalorder %v1166_v52, 0 }
 0x135   :  { %vm879_vm12 = vcmp.lt.s32.totalorder %v878_v47, 0  ;;  %vm1423_vm15 = vcmp.le.f32.partialorder %v310_v1, 0.7853982  ;;  %vm312_vm0 = vcmp.lt.s32.totalorder %v1168_v55, 0  ;;  %v296_v63 = vsel %vm1405_vm13, 0, %v294_v33 }
 0x136   :  { %v381_v61 = vsel %vm879_vm12, 0, %v878_v47  ;;  %v1412_v20 = vshrl.u32 %v577_v4, 30  ;;  %v496_v57 = vmul.f32 %v495_v16, %v493_v3  ;;  %v397_v14 = vsel %vm312_vm0, %v396_v18, %v1356_v31 }
 0x137   :  { %v382_v32 = vsub.s32 32, %v381_v61  ;;  %v386_v0 = vsub.s32 4294967266, %v381_v61  ;;  %v383_v5 = vshll.u32 %v374_v29, %v381_v61  ;;  %v572_v43 = vadd.s32 %v1385_v26, %v1379_v24 }
 0x138   :  { %v579_v2 = vshll.u32 %v1412_v20, 30  ;;  %v497_v23 = vxor.u32 2147483648, %v496_v57  ;;  %vm1440_vm2 = vcmp.le.f32.partialorder %v413_v59, 0.7853982  ;;  %v300_v12 = vand.u32 3, %v296_v63 }
 0x139   :  { %v384_v30 = vshrl.u32 %v366_v60, %v382_v32  ;;  %v387_v6 = vadd.s32 127, %v386_v0  ;;  %v399_v59 = vsel %vm1423_vm15, 0, %v397_v14  ;;  %v499_v32 = vsub.s32 4, %v1292_v39 }
 0x13a   :  { %v580_v11 = vsub.s32 %v576_v35, %v579_v2  ;;  %v498_v36 = vsel %vm415_vm14, %v497_v23, %v496_v57  ;;  %vm302_vm3 = vcmp.eq.s32.totalorder %v300_v12, 0  ;;  %vm305_vm4 = vcmp.eq.s32.totalorder %v300_v12, 2 }
 0x13b   :  { %v385_v17 = vor.u32 %v384_v30, %v383_v5  ;;  %v388_v7 = vshll.u32 %v387_v6, 23  ;;  %v501_v31 = vsel %vm1440_vm2, %v1166_v52, %v498_v36  ;;  %v403_v54 = vand.u32 3, %v399_v59 }
 0x13c   :  { %v582_v15 = vsub.s32 0, %v580_v11  ;;  %vm301_vm5 = vcmp.lt.s32.totalorder %v300_v12, 2  ;;  %vm299_vm6 = vweird.f32 %v1164_v51  ;;  %vm402_vm9 = vweird.f32 %v1168_v55 }
 0x13d   :  { %v389_v8 = vor.u32 4788187, %v388_v7  ;;  %v392_v21 = vcvt.s32.f32 %v385_v17  ;;  %v1050_v19 = vpop.eup %1049  ;;  %vm408_vm7 = vcmp.eq.s32.totalorder %v403_v54, 2  ;;  %vm405_vm8 = vcmp.eq.s32.totalorder %v403_v54, 0 }
 0x13e   :  { %v885_v22 = vmin.u32 %v582_v15, %v580_v11  ;;  %v1052_v34 = vpop.eup %1051  ;;  %v306_v27 = vxor.u32 2147483648, %v1050_v19  ;;  %v500_v17 = vsel %vm415_vm14, %v499_v32, %v1292_v39  ;;  %vm404_vm10 = vcmp.lt.s32.totalorder %v403_v54, 2 }
 0x13f   :  { %v390_v13 = vand.u32 2147483647, %v389_v8  ;;  %v303_v47 = vxor.u32 2147483648, %v1052_v34  ;;  %vm1457_vm11 = vcmp.le.f32.partialorder %v516_v25, 0.7853982  ;;  %vm518_vm12 = vcmp.lt.s32.totalorder %v1170_v56, 0 }
 0x140   :  { %v584_v46 = vclz %v885_v22  ;;  %v307_v35 = vsel %vm305_vm4, %v306_v27, %v1052_v34  ;;  %vm608_vm4 = vweird.f32 %v1170_v56 }
 0x141   :  { %v393_v29 = vmul.f32 %v392_v21, %v390_v13  ;;  %v304_v62 = vsel %vm302_vm3, %v1050_v19, %v303_v47  ;;  %v502_v13 = vsel %vm1440_vm2, 0, %v500_v17  ;;  %v888_v17 = vld [vmem:[%s1488_s4] ss:$0 sm:$0xff] }
 0x142   :  { %v886_v41 = vadd.s32 4294967294, %v584_v46  ;;  %v308_v61 = vsel %vm301_vm5, %v304_v62, %v307_v35 }
 0x143   :  { %v394_v42 = vxor.u32 2147483648, %v393_v29  ;;  %v309_v6 = vsel %vm299_vm6, nan, %v308_v61 }
 0x144   :  { %vm887_vm1 = vcmp.lt.s32.totalorder %v886_v41, 0 }
 0x145   :  { %v395_v40 = vsel %vm312_vm0, %v394_v42, %v393_v29  ;;  %v587_v10 = vsel %vm887_vm1, 0, %v886_v41  ;;  %v506_v29 = vand.u32 3, %v502_v13  ;;  %vm505_vm0 = vweird.f32 %v1166_v52 }
 0x146   :  { %v398_v1 = vsel %vm1423_vm15, %v1168_v55, %v395_v40  ;;  %v588_v44 = vsub.s32 32, %v587_v10  ;;  %v592_v45 = vsub.s32 4294967266, %v587_v10  ;;  %v589_v49 = vshll.u32 %v580_v11, %v587_v10 }
 0x147   :  { %1053 = vcosq.f32 %v398_v1  ;;  %v827_v11 = vmul.f32 %v309_v6, %v309_v6  ;;  %v602_v55 = vsub.s32 4, %v1412_v20  ;;  %vm508_vm13 = vcmp.eq.s32.totalorder %v506_v29, 0 }
 0x148   :  { %1055 = vsinq.f32 %v398_v1  ;;  %v590_v24 = vshrl.u32 %v572_v43, %v588_v44  ;;  %v593_v26 = vadd.s32 127, %v592_v45  ;;  %vm511_vm14 = vcmp.eq.s32.totalorder %v506_v29, 2 }
 0x149   :  { %1057 = vcosq.f32 %v501_v31  ;;  %v603_v18 = vsel %vm518_vm12, %v602_v55, %v1412_v20  ;;  %vm507_vm15 = vcmp.lt.s32.totalorder %v506_v29, 2 }
 0x14a   :  { %v591_v53 = vor.u32 %v590_v24, %v589_v49  ;;  %v594_v58 = vshll.u32 %v593_v26, 23  ;;  %1059 = vsinq.f32 %v501_v31  ;;  %v605_v46 = vsel %vm1457_vm11, 0, %v603_v18 }
 0x14b   :  { %v609_v36 = vand.u32 3, %v605_v46 }
 0x14c   :  { %v595_v60 = vor.u32 4788187, %v594_v58  ;;  %v598_v48 = vcvt.s32.f32 %v591_v53 }
 0x14d   :  { %vm614_vm1 = vcmp.eq.s32.totalorder %v609_v36, 2  ;;  %vm611_vm2 = vcmp.eq.s32.totalorder %v609_v36, 0  ;;  %vm610_vm3 = vcmp.lt.s32.totalorder %v609_v36, 2 }
 0x14e   :  { %v596_v4 = vand.u32 2147483647, %v595_v60 }
 0x150   :  { %v599_v30 = vmul.f32 %v598_v48, %v596_v4  ;;  %v852_v4 = vand.u32 127, %v41_v38 }
 0x151   :  { %v1054_v0 = vpop.eup %1053 }
 0x152   :  { %v1056_v3 = vpop.eup %1055  ;;  %v409_v28 = vxor.u32 2147483648, %v1054_v0  ;;  %v600_v2 = vxor.u32 2147483648, %v599_v30  ;;  %vm853_vm5 = vcmp.eq.s32.totalorder %v852_v4, 0 }
 0x153   :  { %v406_v5 = vxor.u32 2147483648, %v1056_v3  ;;  %v1058_v57 = vpop.eup %1057 }
 0x154   :  { %v410_v16 = vsel %vm408_vm7, %v409_v28, %v1056_v3  ;;  %v601_v39 = vsel %vm518_vm12, %v600_v2, %v599_v30  ;;  %v1060_v21 = vpop.eup %1059  ;;  %v512_v42 = vxor.u32 2147483648, %v1058_v57 }
 0x155   :  { %v407_v7 = vsel %vm405_vm8, %v1054_v0, %v406_v5  ;;  %v604_v25 = vsel %vm1457_vm11, %v1170_v56, %v601_v39  ;;  %v509_v33 = vxor.u32 2147483648, %v1060_v21 }
 0x156   :  { %v411_v8 = vsel %vm404_vm10, %v407_v7, %v410_v16  ;;  %1061 = vcosq.f32 %v604_v25  ;;  %v513_v19 = vsel %vm511_vm14, %v512_v42, %v1060_v21 }
 0x157   :  { %v412_v50 = vsel %vm402_vm9, nan, %v411_v8  ;;  %1063 = vsinq.f32 %v604_v25  ;;  %v510_v37 = vsel %vm508_vm13, %v1058_v57, %v509_v33 }
 0x158   :  { %747 = vmatprep.mubr.f32.mxu0 %v412_v50  ;;  %v823_v15 = vadd.f32 %v412_v50, %v309_v6  ;;  %v828_v23 = vmul.f32 %v412_v50, %v412_v50  ;;  %v514_v40 = vsel %vm507_vm15, %v510_v37, %v513_v19 }
 0x159   :  { %748 = vmatmul.mubr.f32.vlgmr.msra.gmra.mrb[2].mxu0 %v309_v6  ;;  %v515_v20 = vsel %vm505_vm0, nan, %v514_v40 }
 0x15a   :  { %824 = vadd.xlane.f32.xlu0 %v823_v15  ;;  %v829_v22 = vadd.f32 %v828_v23, %v827_v11  ;;  %v841_v10 = vmul.f32 %v515_v20, %v515_v20 }
 0x15c   :  { %830 = vadd.xlane.f32.xlu1 %v829_v22 }
 0x160   :  { %v1062_v41 = vpop.eup %1061 }
 0x161   :  { %v1064_v63 = vpop.eup %1063  ;;  %v615_v34 = vxor.u32 2147483648, %v1062_v41 }
 0x162   :  { %v612_v14 = vxor.u32 2147483648, %v1064_v63 }
 0x163   :  { %v616_v1 = vsel %vm614_vm1, %v615_v34, %v1064_v63 }
 0x164   :  { %v613_v43 = vsel %vm611_vm2, %v1062_v41, %v612_v14 }
 0x165   :  { %v617_v9 = vsel %vm610_vm3, %v613_v43, %v616_v1 }
 0x166   :  { %v618_v12 = vsel %vm608_vm4, nan, %v617_v9 }
 0x167   :  { %817 = vmatprep.mubr.f32.mxu1 %v618_v12  ;;  %v837_v31 = vadd.f32 %v618_v12, %v515_v20  ;;  %v842_v44 = vmul.f32 %v618_v12, %v618_v12 }
 0x168   :  { %818 = vmatmul.mubr.f32.vlgmr.msra.gmra.mrb[2].mxu1 %v515_v20 }
 0x169   :  { %838 = vadd.xlane.f32.xlu0 %v837_v31  ;;  %v843_v45 = vadd.f32 %v842_v44, %v841_v10 }
 0x16b   :  { %844 = vadd.xlane.f32.xlu1 %v843_v45 }
 0x1e7   :  { %v825_v52 = vpop.xlane.xlu0 %824 }
 0x1e8   :  { %v826_v26 = vmul.f32 0.00390625, %v825_v52 }
 0x1e9   :  { %v831_v47 = vpop.xlane.xlu1 %830 }
 0x1ea   :  { %v833_v58 = vmul.f32 %v826_v26, %v826_v26  ;;  %v832_v56 = vmul.f32 0.00390625, %v831_v47 }
 0x1ec   :  { %v834_v61 = vsub.f32 %v832_v56, %v833_v58 }
 0x1ee   :  { %v835_v0 = vadd.f32 1e-05, %v834_v61 }
 0x1f6   :  { %v839_v27 = vpop.xlane.xlu0 %838 }
 0x1f7   :  { %v840_v49 = vmul.f32 0.00390625, %v839_v27 }
 0x1f8   :  { %v845_v24 = vpop.xlane.xlu1 %844 }
 0x1f9   :  { %v847_v59 = vmul.f32 %v840_v49, %v840_v49  ;;  %v846_v53 = vmul.f32 0.00390625, %v845_v24 }
 0x1fb   :  { %v848_v54 = vsub.f32 %v846_v53, %v847_v59 }
 0x1fd   :  { %v849_v32 = vadd.f32 1e-05, %v848_v54 }
 0x1ff   :  { %1065 = vrsqrt.f32 %v849_v32 }
 0x200   :  { %1067 = vrsqrt.f32 %v835_v0 }
 0x209   :  { %v1066_v28 = vpop.eup %1065 }
 0x20a   :  { %v1068_v30 = vpop.eup %1067 }
 0x20b   :  { %v854_v16 = vsel %vm853_vm5, %v1068_v30, %v1066_v28 }
 0x22c   :  { %v921_v62 = vpop.f32.mrb[2].mxu0 }
 0x22d   :  { %v922_v35 = vpop.f32.mrb[3].mxu0 }
 0x22e   :  { %v923_v60 = vadd.f32 %v922_v35, %v921_v62 }
 0x23b   :  { %v956_v48 = vpop.f32.mrb[2].mxu1 }
 0x23c   :  { %v957_v3 = vpop.f32.mrb[3].mxu1 }
 0x23d   :  { %v958_v5 = vadd.f32 %v957_v3, %v956_v48 }
 0x23f   :  { %v820_v6 = vadd.f32 %v958_v5, %v923_v60 }
 0x241   :  { %v855_v7 = vmul.f32 %v854_v16, %v820_v6 }
 0x243   :  { %v863_v2 = vadd.f32 %v888_v17, %v855_v7 }
 0x245   :  { %864 = vst [vmem:[%s1489_s5] sm:$0xff] %v863_v2 }
 0x246   :  { %869 = vsyncpa [#allocation3], 1 }

</bundles_post_ra>
